<compile_context>
chip_gen: v6e
topology: v6e:2x2x1
jax: 0.10.0
libtpu: 0.0.40
codegen_flags: <defaults>
</compile_context>

<pallas_src>
import functools
import math

import jax
import jax.numpy as jnp
from jax.experimental import pallas as pl
from jax.experimental.pallas import tpu as pltpu

_BIG = 1e30                     # sigmoid(+_BIG)=1, sigmoid(-_BIG)=0 exactly in f32
_MIN_STEPS = 8                  # aim for >=8 grid steps (v7x TC sharding)
_TARGET_TILE_BYTES = 2 << 20    # >= ~2 MiB of x per step (per-step overhead)


def _round_up(n: int, m: int) -> int:
    return ((n + m - 1) // m) * m


def _vmem_capacity_bytes() -> int:
    """Per-TensorCore VMEM capacity; conservative fallback if the query fails."""
    try:
        return int(pltpu.get_tpu_info().vmem_capacity_bytes)
    except Exception:
        return 64 * 1024 * 1024  # v7x per-TC size (smallest of the supported gens)


def _ordered_logit_kernel(x_ref, w_ref, chi_ref, clo_ref, out_ref):
    """One batch tile: probs = sigmoid(cut_hi - x.w) - sigmoid(cut_lo - x.w)."""
    x = x_ref[...].astype(jnp.float32)                    # [TB, F] (bf16 -> f32 here)
    w = w_ref[...]                                        # [1,  F] f32
    # betax without bias (bias folded into the cutpoint vectors).
    # VPU multiply + XLU lane reduce; deliberately NOT routed through the MXU.
    xw = jnp.sum(x * w, axis=1, keepdims=True)            # [TB, 1] f32 accumulation

    z_hi = chi_ref[...] - xw                              # [TB, C]
    z_lo = clo_ref[...] - xw                              # [TB, C]

    # Plain sigmoid is exact at the +/-BIG sentinels (exp under/overflow -> 1/0).
    sig_hi = 1.0 / (1.0 + jnp.exp(-z_hi))
    sig_lo = 1.0 / (1.0 + jnp.exp(-z_lo))
    out_ref[...] = sig_hi - sig_lo                        # [TB, C]


@functools.partial(jax.jit, static_argnames=("tile_rows",))
def ordered_logit_forward(x, weight, bias, deltas, *, tile_rows=None):
    """JAX/Pallas equivalent of OrderedLogitLayer.forward().

    x       : [B, F] inputs (f32 or bf16; other dtypes are cast to f32)
    weight  : [1, F] linear weight
    bias    : [1]    linear bias
    deltas  : [C-2]  log-spacing parameters
    returns : [B, C] class probabilities (rows sum to 1)
    """
    x = jnp.asarray(x)
    if x.dtype != jnp.bfloat16 and x.dtype != jnp.float32:
        x = x.astype(jnp.float32)          # keep bf16 as-is: the kernel is x-read bound
    B, F = x.shape

    deltas = jnp.asarray(deltas, jnp.float32)
    C = int(deltas.shape[0]) + 2
    weight = jnp.asarray(weight, jnp.float32).reshape(1, F)
    bias = jnp.asarray(bias, jnp.float32).reshape(1)

    # Grid-invariant cutpoint math (tiny, O(C)) hoisted out of the kernel; the
    # linear bias is folded in so the kernel needs no separate bias add.
    cutpoints = jnp.cumsum(
        jnp.concatenate([jnp.zeros((1,), jnp.float32), jnp.exp(deltas)]))      # [C-1]
    cut_hi = jnp.concatenate([cutpoints, jnp.full((1,), _BIG, jnp.float32)])   # [C]
    cut_lo = jnp.concatenate([jnp.full((1,), -_BIG, jnp.float32), cutpoints])  # [C]
    chi = (cut_hi - bias).reshape(1, C)
    clo = (cut_lo - bias).reshape(1, C)

    # ---- Tile-size policy (generation-aware VMEM budget) --------------------
    sub = 16 if x.dtype == jnp.bfloat16 else 8            # sublane packing unit
    x_row_bytes = F * x.dtype.itemsize
    out_row_bytes = 4 * _round_up(C, 128)                 # lane-padded f32 out block
    per_row_bytes = 2 * x_row_bytes + 2 * out_row_bytes   # double-buffered x + out
    const_bytes = 2 * 4 * F + 4 * 4 * _round_up(C, 128)   # weight + chi + clo buffers

    vmem_cap = _vmem_capacity_bytes()
    data_budget = (vmem_cap * 3) // 4                     # 48 MiB v7x, 96 MiB v5e/v6e

    if tile_rows is not None:
        tb = _round_up(max(int(tile_rows), sub), sub)
    else:
        tb_budget = max(sub, ((data_budget - const_bytes) // per_row_bytes) // sub * sub)
        tb_steps = _round_up(pl.cdiv(B, _MIN_STEPS), sub)              # >= _MIN_STEPS steps
        tb_target = _round_up(pl.cdiv(_TARGET_TILE_BYTES, x_row_bytes), sub)  # >= ~2 MiB x
        tb = min(tb_budget, max(tb_steps, tb_target))
    # Never exceed the batch (largest multiple of `sub` <= B); the last grid
    # block may be partial - Pallas masks its writes, and rows are independent.
    tb_cap = max(sub, (B // sub) * sub)
    tb = max(sub, min(tb, tb_cap))
    grid = (pl.cdiv(B, tb),)

    footprint = tb * per_row_bytes + const_bytes + (1 << 20)
    vmem_limit = int(max(16 << 20, min(vmem_cap, footprint + (2 << 20))))

    out = pl.pallas_call(
        _ordered_logit_kernel,
        out_shape=jax.ShapeDtypeStruct((B, C), jnp.float32),
        grid_spec=pltpu.PrefetchScalarGridSpec(
            num_scalar_prefetch=0,
            grid=grid,
            in_specs=[
                pl.BlockSpec((tb, F), lambda i: (i, 0)),   # x tile (streamed, pipelined)
                pl.BlockSpec((1, F), lambda i: (0, 0)),    # weight (resident)
                pl.BlockSpec((1, C), lambda i: (0, 0)),    # cut_hi - bias
                pl.BlockSpec((1, C), lambda i: (0, 0)),    # cut_lo - bias
            ],
            out_specs=pl.BlockSpec((tb, C), lambda i: (i, 0)),
        ),
        compiler_params=pltpu.CompilerParams(
            dimension_semantics=("parallel",),             # batch tiles are independent
            vmem_limit_bytes=vmem_limit,
        ),
        cost_estimate=pl.CostEstimate(
            flops=2 * B * F + 6 * B * C,
            transcendentals=2 * B * C,
            bytes_accessed=B * F * x.dtype.itemsize + 4 * (B * C + 2 * F + 2 * C),
        ),
    )(x, weight, chi, clo)

    return out


class OrderedLogitLayerPallas:
    """Module-style wrapper mirroring the PyTorch OrderedLogitLayer."""

    def __init__(self, size_in: int, num_classes: int,
                 init_cutpoints: str = "equal_spaced", key=None):
        self.size_in = size_in
        self.num_classes = num_classes
        self.num_deltas = num_classes - 2
        self.threshold_step = 1.0
        self.init_cutpoints = init_cutpoints

        if key is None:
            key = jax.random.PRNGKey(0)
        kw, kb, kd = jax.random.split(key, 3)
        bound = 1.0 / math.sqrt(size_in)   # torch.nn.Linear default init bound
        self.weight = jax.random.uniform(
            kw, (1, size_in), minval=-bound, maxval=bound, dtype=jnp.float32)

        if init_cutpoints == "equal_spaced":
            self.deltas = jnp.log(
                jnp.full((self.num_deltas,), self.threshold_step, jnp.float32))
            self.bias = jnp.full(
                (1,), self.threshold_step * self.num_deltas / 2.0, jnp.float32)
        elif init_cutpoints == "random_spaced":
            self.deltas = jnp.log(
                jax.random.uniform(kd, (self.num_deltas,), dtype=jnp.float32))
            self.bias = jax.random.uniform(
                kb, (1,), minval=-bound, maxval=bound, dtype=jnp.float32)
        else:
            raise ValueError(f"{init_cutpoints} is not a valid init_cutpoints type")

    def __call__(self, x, *, tile_rows=None):
        return ordered_logit_forward(
            x, self.weight, self.bias, self.deltas, tile_rows=tile_rows)


def _reference(x, weight, bias, deltas):
    """Pure-JAX reference matching the PyTorch forward exactly."""
    x = jnp.asarray(x, jnp.float32)
    weight = jnp.asarray(weight, jnp.float32).reshape(1, -1)
    bias = jnp.asarray(bias, jnp.float32).reshape(1)
    deltas = jnp.asarray(deltas, jnp.float32)
    betax = x @ weight.T + bias                                        # [B, 1]
    cutpoints = jnp.cumsum(
        jnp.concatenate([jnp.zeros((1,), jnp.float32), jnp.exp(deltas)]))
    cdf = jax.nn.sigmoid(cutpoints[None, :] - betax)                   # [B, C-1]
    probs = jnp.concatenate(
        [cdf[:, :1], cdf[:, 1:] - cdf[:, :-1], 1.0 - cdf[:, -1:]], axis=1)
    return probs


if __name__ == "__main__":
    key = jax.random.PRNGKey(0)
    kx, km, kx2 = jax.random.split(key, 3)

    B, F, C = 8, 32, 5
    layer = OrderedLogitLayerPallas(size_in=F, num_classes=C, key=km)
    x = jax.random.normal(kx, (B, F), dtype=jnp.float32)

    probs = jax.block_until_ready(layer(x))
    ref = _reference(x, layer.weight, layer.bias, layer.deltas)
    assert probs.shape == (B, C), probs.shape
    # Equivalent of the in-forward torch assert (checked host-side).
    assert jnp.allclose(jnp.sum(probs, axis=1), 1.0, atol=1e-5)
    assert jnp.allclose(probs, ref, rtol=1e-5, atol=1e-5)

    # Multi-step grid with a masked partial last block and NO wrapper-side pad:
    # B=200, tile_rows=64 -> grid=4, last block has 8 valid rows out of 64.
    B2 = 200
    x2 = jax.random.normal(kx2, (B2, F), dtype=jnp.float32)
    probs2 = jax.block_until_ready(
        ordered_logit_forward(x2, layer.weight, layer.bias, layer.deltas,
                              tile_rows=64))
    ref2 = _reference(x2, layer.weight, layer.bias, layer.deltas)
    assert probs2.shape == (B2, C)
    assert jnp.allclose(probs2, ref2, rtol=1e-5, atol=1e-5)

    # bf16 activation path: x streamed as bf16 (half the HBM bytes), cast to
    # f32 inside the kernel.  Compare against the f32 reference evaluated on
    # the bf16-rounded inputs (accumulation is f32 in both).
    x2_bf16 = x2.astype(jnp.bfloat16)
    probs3 = jax.block_until_ready(
        ordered_logit_forward(x2_bf16, layer.weight, layer.bias, layer.deltas))
    ref3 = _reference(x2_bf16.astype(jnp.float32),
                      layer.weight, layer.bias, layer.deltas)
    assert probs3.shape == (B2, C)
    assert jnp.allclose(probs3, ref3, rtol=1e-4, atol=1e-4)
    assert jnp.allclose(jnp.sum(probs3, axis=1), 1.0, atol=1e-4)

    print("KERNEL_OK")
</pallas_src>

<mosaic_0001>
module attributes {stable_mosaic.version = 11 : i64} {
  func.func @_ordered_logit_kernel(%arg0: i32, %arg1: memref<8x32xf32, #tpu.memory_space<vmem>>, %arg2: memref<1x32xf32, #tpu.memory_space<vmem>>, %arg3: memref<1x5xf32, #tpu.memory_space<vmem>>, %arg4: memref<1x5xf32, #tpu.memory_space<vmem>>, %arg5: memref<8x5xf32, #tpu.memory_space<vmem>>) attributes {dimension_semantics = [#tpu.dimension_semantics<parallel>], iteration_bounds = array<i64: 1>, scalar_prefetch = 0 : i64, scratch_operands = 0 : i64, tpu.core_type = #tpu.core_type<tc>, window_params = [{transform_indices = @transform_0, window_bounds = array<i64: 8, 32>}, {pipeline_mode = #tpu.pipeline_mode<synchronous>, transform_indices = @transform_1, window_bounds = array<i64: 1, 32>}, {pipeline_mode = #tpu.pipeline_mode<synchronous>, transform_indices = @transform_2, window_bounds = array<i64: 1, 5>}, {pipeline_mode = #tpu.pipeline_mode<synchronous>, transform_indices = @transform_3, window_bounds = array<i64: 1, 5>}, {transform_indices = @transform_4, window_bounds = array<i64: 8, 5>}]} {
    %c0 = arith.constant 0 : index
    %c0_0 = arith.constant 0 : index
    %0 = vector.load %arg1[%c0, %c0_0] : memref<8x32xf32, #tpu.memory_space<vmem>>, vector<8x32xf32>
    %c0_1 = arith.constant 0 : index
    %c0_2 = arith.constant 0 : index
    %1 = vector.load %arg2[%c0_1, %c0_2] : memref<1x32xf32, #tpu.memory_space<vmem>>, vector<1x32xf32>
    %2 = vector.broadcast %1 : vector<1x32xf32> to vector<8x32xf32>
    %3 = arith.mulf %0, %2 : vector<8x32xf32>
    %cst = arith.constant dense<0.000000e+00> : vector<8xf32>
    %4 = vector.multi_reduction <add>, %3, %cst [1] : vector<8x32xf32> to vector<8xf32>
    %5 = vector.shape_cast %4 : vector<8xf32> to vector<8x1xf32>
    %c0_3 = arith.constant 0 : index
    %c0_4 = arith.constant 0 : index
    %6 = vector.load %arg3[%c0_3, %c0_4] : memref<1x5xf32, #tpu.memory_space<vmem>>, vector<1x5xf32>
    %7 = vector.broadcast %6 : vector<1x5xf32> to vector<8x5xf32>
    %8 = vector.broadcast %5 : vector<8x1xf32> to vector<8x5xf32>
    %9 = arith.subf %7, %8 : vector<8x5xf32>
    %c0_5 = arith.constant 0 : index
    %c0_6 = arith.constant 0 : index
    %10 = vector.load %arg4[%c0_5, %c0_6] : memref<1x5xf32, #tpu.memory_space<vmem>>, vector<1x5xf32>
    %11 = vector.broadcast %10 : vector<1x5xf32> to vector<8x5xf32>
    %12 = vector.broadcast %5 : vector<8x1xf32> to vector<8x5xf32>
    %13 = arith.subf %11, %12 : vector<8x5xf32>
    %cst_7 = arith.constant 0.000000e+00 : f32
    %14 = vector.broadcast %cst_7 : f32 to vector<8x5xf32>
    %15 = arith.subf %14, %9 : vector<8x5xf32>
    %16 = math.exp %15 : vector<8x5xf32>
    %cst_8 = arith.constant 1.000000e+00 : f32
    %17 = vector.broadcast %cst_8 : f32 to vector<8x5xf32>
    %18 = arith.addf %17, %16 : vector<8x5xf32>
    %cst_9 = arith.constant 1.000000e+00 : f32
    %19 = vector.broadcast %cst_9 : f32 to vector<8x5xf32>
    %20 = arith.divf %19, %18 : vector<8x5xf32>
    %cst_10 = arith.constant 0.000000e+00 : f32
    %21 = vector.broadcast %cst_10 : f32 to vector<8x5xf32>
    %22 = arith.subf %21, %13 : vector<8x5xf32>
    %23 = math.exp %22 : vector<8x5xf32>
    %cst_11 = arith.constant 1.000000e+00 : f32
    %24 = vector.broadcast %cst_11 : f32 to vector<8x5xf32>
    %25 = arith.addf %24, %23 : vector<8x5xf32>
    %cst_12 = arith.constant 1.000000e+00 : f32
    %26 = vector.broadcast %cst_12 : f32 to vector<8x5xf32>
    %27 = arith.divf %26, %25 : vector<8x5xf32>
    %28 = arith.subf %20, %27 : vector<8x5xf32>
    %c0_13 = arith.constant 0 : index
    %c0_14 = arith.constant 0 : index
    %29 = vector.load %arg5[%c0_13, %c0_14] : memref<8x5xf32, #tpu.memory_space<vmem>>, vector<8x5xf32>
    tpu.vector_store %arg5[%c0_13, %c0_14], %28 {strides = array<i32>} : memref<8x5xf32, #tpu.memory_space<vmem>>, vector<8x5xf32>,
    return
  }
  func.func @transform_0(%arg0: i32) -> (i32, i32) {
    %c0_i32 = arith.constant 0 : i32
    %c0_i32_0 = arith.constant 0 : i32
    return %arg0, %c0_i32 : i32, i32
  }
  func.func @transform_1(%arg0: i32) -> (i32, i32) {
    %c0_i32 = arith.constant 0 : i32
    %c0_i32_0 = arith.constant 0 : i32
    %c0_i32_1 = arith.constant 0 : i32
    return %c0_i32, %c0_i32_0 : i32, i32
  }
  func.func @transform_2(%arg0: i32) -> (i32, i32) {
    %c0_i32 = arith.constant 0 : i32
    %c0_i32_0 = arith.constant 0 : i32
    %c0_i32_1 = arith.constant 0 : i32
    return %c0_i32, %c0_i32_0 : i32, i32
  }
  func.func @transform_3(%arg0: i32) -> (i32, i32) {
    %c0_i32 = arith.constant 0 : i32
    %c0_i32_0 = arith.constant 0 : i32
    %c0_i32_1 = arith.constant 0 : i32
    return %c0_i32, %c0_i32_0 : i32, i32
  }
  func.func @transform_4(%arg0: i32) -> (i32, i32) {
    %c0_i32 = arith.constant 0 : i32
    %c0_i32_0 = arith.constant 0 : i32
    return %arg0, %c0_i32 : i32, i32
  }
}

</mosaic_0001>

<bundles_post_ra>
// kernel: ordered_logit_forward.1
= control target key start
LH: loop header
LB: loop body
LE: loop exit
PB: predicated region body
PF: predicated region fallthrough
CT: control target
= control target key end

     0   :  { %vm27_vm0 = vcmask 261120   ;;  %s151_s0 = inlined_call_operand.vmem [shape: f32[8,32], index: 0, kind: input, shape index: {}]   ;;  %s152_s1 = inlined_call_operand.vmem [shape: f32[1,32], index: 1, kind: input, shape index: {}]   ;;  %s153_s2 = inlined_call_operand.vmem [shape: f32[1,5], index: 2, kind: input, shape index: {}]   ;;  %s154_s3 = inlined_call_operand.vmem [shape: f32[1,5], index: 3, kind: input, shape index: {}]   ;;  %s155_s4 = inlined_call_operand.hbm [shape: f32[8,5], index: 4, kind: output, shape index: {}]  }
   0x1   :  { %v18_v0 = vld [vmem:[%s151_s0] sm:$0xff] }
   0x2   :  { %v76_v1 = vld [vmem:[%s152_s1] ss:$0 sm:$0xff] }
   0x3   :  { %9 = vsyncpa [#allocation3], 0  ;;  %v26_v2 = vmul.f32 %v76_v1, %v18_v0  ;;  %v77_v4 = vld [vmem:[%s153_s2] ss:$0 sm:$0xff]  ;;  %s110_s0 = smov [#allocation2]   ;;  %vm60_vm1 = vcmask 39936  }
   0x4   :  { %v78_v5 = vld [vmem:[%s154_s3] ss:$0 sm:$0xff]  ;;  %s68_s1 = sshll.u32 %s110_s0, 4  ;;  %s69_s1 = int_to_ptr.vmem [resolvable:$true] %s68_s1 }
   0x5   :  { %v28_v3 = vsel %vm27_vm0, %v26_v2, 0.0  ;;  %s88_s2 = scalar_lea.vmem %s69_s1, 128  ;;  %p93_p1 = scmp.lt.s32.totalorder %s69_s1, %s69_s1 }
   0x6   :  { %29 = vadd.xlane.f32.xlu0 %v28_v3  ;;  %p89_p0 = scmp.ne.s32.totalorder %s69_s1, %s88_s2  ;;  %p94_p2 = scmp.lt.s32.totalorder %s88_s2, %s88_s2 }
   0x8   :  { %p95_p3 = por %p94_p2, %p93_p1 }
   0xa   :  { %p96_p4 = pnand %p95_p3, %p89_p0 }
  0x8f   :  { %v30_v6 = vpop.xlane.xlu0 %29 }
  0x90   :  { %v38_v7 = vsub.f32 %v77_v4, %v30_v6  ;;  %v46_v8 = vsub.f32 %v78_v5, %v30_v6 }
  0x92   :  { %v47_v9 = vsub.f32 0.0, %v38_v7  ;;  %v53_v10 = vsub.f32 0.0, %v46_v8 }
  0x94   :  { %v48_v11 = vmul.f32 1.442695, %v47_v9  ;;  %v54_v12 = vmul.f32 1.442695, %v53_v10 }
  0x96   :  { %80 = vpow2.f32 %v48_v11 }
  0x97   :  { %82 = vpow2.f32 %v54_v12 }
  0xa3   :  { %v81_v13 = vpop.eup %80 }
  0xa4   :  { %v83_v14 = vpop.eup %82  ;;  %v50_v15 = vadd.f32 1.0, %v81_v13 }
  0xa5   :  { %v56_v16 = vadd.f32 1.0, %v83_v14 }
  0xa6   :  { %84 = vrcp.f32 %v50_v15 }
  0xa7   :  { %86 = vrcp.f32 %v56_v16 }
  0xb3   :  { %v85_v17 = vpop.eup %84 }
  0xb4   :  { %v87_v18 = vpop.eup %86 }
  0xb5   :  { %v59_v19 = vsub.f32 %v85_v17, %v87_v18 }
  0xb7   :  { %61 = vst.msk [vmem:[#allocation2] sm:$0xff] %vm60_vm1, %v59_v19 }
  0xb8   :  { %99 = shalt.err (!%p96_p4)
}
  0xb9   :  { %71 = dma.vmem_to_hbm [thread:$0]  %s69_s1, 128, %s155_s4, [#allocation3]  }
  0xba   :  { %108 = dma.done.wait [#allocation3], 128  }
  0xbb   :  { %109 = vsyncadd [#allocation3], 4294967168 }
  0xbc   :  { %75 = vsyncpa [#allocation3], 1 }

</bundles_post_ra>
